<compile_context>
chip_gen: v7x
topology: tpu7x:2x2x1
jax: 0.10.0
libtpu: 0.0.40
codegen_flags: <defaults>
</compile_context>

<pallas_src>
import functools

import jax
import jax.numpy as jnp
from jax import lax
from jax.experimental import pallas as pl
from jax.experimental.pallas import tpu as pltpu

_LANE = 128
_MIB = 1024 * 1024
# Streamed HBM bytes per grid step (both tensors): big enough that the
# ~0.35 us/step overhead is <5% on every generation.
_MAX_STREAM_BYTES_PER_STEP = 16 * _MIB
_DEFAULT_VMEM_CAP = 128 * _MIB


def _vmem_capacity_bytes():
    """Per-generation VMEM capacity (v5e/v6e: 128 MiB, v7x: 64 MiB)."""
    try:
        return int(pltpu.get_tpu_info().vmem_capacity_bytes)
    except Exception:
        return _DEFAULT_VMEM_CAP


def _pick_tile_g(g_total, b, itemsize, vmem_budget):
    """Largest G-tile such that the double-buffered working set fits the
    per-generation VMEM budget and each step streams <= _MAX_STREAM bytes.
    Returns 0 to request the plain-jnp fallback (degenerate/huge-batch case)."""
    # VMEM bytes per unit of TILE_G:
    #   2 inputs x 2 pipeline buffers x B x 128 x itemsize   (input blocks)
    # + 2 f32 accumulators x 2 buffers x 128 x 4              (resident outputs)
    per_g_vmem = 4 * b * _LANE * itemsize + 4 * _LANE * 4
    per_g_stream = 2 * b * _LANE * itemsize
    sub = {4: 8, 2: 16, 1: 32}.get(itemsize, 32)   # sublane packing multiple

    max_by_vmem = vmem_budget // per_g_vmem
    max_by_stream = max(_MAX_STREAM_BYTES_PER_STEP // per_g_stream, 1)
    tile = min(max_by_vmem, max_by_stream)
    if tile >= g_total:
        return g_total          # single tile along G (full-dim block => always legal)
    if tile < sub:
        # TODO(synk): batch is so large a minimal block overflows VMEM; add a
        # batch-tiled reduction axis instead of falling back to plain jnp.
        return 0
    # Multiple of 32 keeps sublane tiling legal for f32/bf16/int8 partial blocks.
    return max((tile // 32) * 32, sub)


def _dc_loss_kernel(pred_ref, tgt_ref, sq_ref, t2_ref, *,
                    n_inner, tile_g, g_total, needs_mask):
    """One (B, TILE_G, 128) block: accumulate per-lane partials of
    (sum_b(t - p))^2 and sum_b(t^2) into resident (1, TILE_G, 128) outputs."""
    ii = pl.program_id(1)                      # inner (reduction) axis

    @pl.when(ii == 0)
    def _():
        sq_ref[...] = jnp.zeros_like(sq_ref)
        t2_ref[...] = jnp.zeros_like(t2_ref)

    def accumulate(masked):
        # Cast in-kernel (free on VPU; avoids any wrapper-side HBM copy).
        p = pred_ref[...].astype(jnp.float32)          # (B, TILE_G, 128)
        t = tgt_ref[...].astype(jnp.float32)
        if masked:
            g_blk = pl.program_id(0) * n_inner + ii    # global tile index
            row_limit = g_total - g_blk * tile_g       # valid rows in this tile
            rows = lax.broadcasted_iota(jnp.int32, (1, tile_g, _LANE), 1)
            valid = rows < row_limit
            p = jnp.where(valid, p, 0.0)
            t = jnp.where(valid, t, 0.0)
        # Fused batch means: d = sum_b(t - p); 1/B and 1/B^2 applied in wrapper.
        d = jnp.sum(t - p, axis=0, keepdims=True)      # (1, TILE_G, 128), pure VPU
        sq_ref[...] += d * d
        t2_ref[...] += jnp.sum(t * t, axis=0, keepdims=True)

    if needs_mask:
        g_blk = pl.program_id(0) * n_inner + ii
        is_full = (g_blk + 1) * tile_g <= g_total

        @pl.when(is_full)
        def _():
            accumulate(False)                          # hot path: no mask cost

        @pl.when(jnp.logical_not(is_full))
        def _():
            accumulate(True)                           # ragged / overrun tile
    else:
        accumulate(False)


@functools.partial(jax.jit, static_argnames=("epsilon",))
def dc_loss(output, target, *, epsilon=1e-5):
    assert output.shape == target.shape
    b = output.shape[0]

    # Reshape only (free metadata op); NO dtype cast, NO jnp.pad in HBM.
    pred = output.reshape(b, -1)
    tgt = target.reshape(b, -1)
    f = pred.shape[1]

    g_total = f // _LANE
    f_main = g_total * _LANE

    vmem_cap = _vmem_capacity_bytes()
    vmem_limit = (vmem_cap * 3) // 4            # ~96 MiB v5e/v6e, ~48 MiB v7x
    vmem_budget = vmem_limit - 8 * _MIB         # headroom for sems / internals

    tile_g = (_pick_tile_g(g_total, b, pred.dtype.itemsize, vmem_budget)
              if g_total > 0 else 0)

    sq_total = jnp.zeros((), jnp.float32)
    t2_total = jnp.zeros((), jnp.float32)

    if tile_g > 0:
        n_tiles = pl.cdiv(g_total, tile_g)
        n_par = 2 if n_tiles >= 2 else 1        # megacore-friendly outer split
        n_inner = pl.cdiv(n_tiles, n_par)
        overrun = n_par * n_inner > n_tiles     # uneven split -> 1 duplicate tile
        needs_mask = (g_total % tile_g != 0) or overrun

        if f_main == f:
            pred_m = pred.reshape(b, g_total, _LANE)   # metadata-only
            tgt_m = tgt.reshape(b, g_total, _LANE)
        else:
            # TODO(synk): this slice materializes a copy of the lane-aligned
            # prefix; an in-kernel lane mask on the flat layout would avoid it.
            pred_m = pred[:, :f_main].reshape(b, g_total, _LANE)
            tgt_m = tgt[:, :f_main].reshape(b, g_total, _LANE)

        if overrun:
            # Clamp the duplicate tile's read in-bounds; its contribution is
            # masked to zero inside the kernel.
            in_map = lambda ip, ii: (0, jnp.minimum(ip * n_inner + ii,
                                                    n_tiles - 1), 0)
        else:
            in_map = lambda ip, ii: (0, ip * n_inner + ii, 0)
        out_map = lambda ip, ii: (ip, 0, 0)     # resident across the inner axis

        acc_shape = jax.ShapeDtypeStruct((n_par, tile_g, _LANE), jnp.float32)
        kernel = functools.partial(_dc_loss_kernel, n_inner=n_inner,
                                   tile_g=tile_g, g_total=g_total,
                                   needs_mask=needs_mask)

        partial_sq, partial_t2 = pl.pallas_call(
            kernel,
            out_shape=(acc_shape, acc_shape),
            grid_spec=pltpu.PrefetchScalarGridSpec(
                num_scalar_prefetch=0,
                grid=(n_par, n_inner),
                in_specs=[
                    pl.BlockSpec((b, tile_g, _LANE), in_map),
                    pl.BlockSpec((b, tile_g, _LANE), in_map),
                ],
                out_specs=[
                    pl.BlockSpec((1, tile_g, _LANE), out_map),
                    pl.BlockSpec((1, tile_g, _LANE), out_map),
                ],
            ),
            compiler_params=pltpu.CompilerParams(
                # TODO(synk): on v7x, pltpu.CORE_PARALLEL on the outer axis may
                # be needed to guarantee 2-TC sharding; kept "parallel" for
                # portability across v5e/v6e/v7x.
                dimension_semantics=("parallel", "arbitrary"),
                vmem_limit_bytes=int(vmem_limit),
            ),
        )(pred_m, tgt_m)

        # Tree-sum the tiny per-lane / per-core partials (jnp handles pairwise
        # reduction; also fixes single-scalar f32 accumulation drift).
        sq_total = sq_total + jnp.sum(partial_sq, dtype=jnp.float32)
        t2_total = t2_total + jnp.sum(partial_t2, dtype=jnp.float32)
    else:
        f_main = 0   # degenerate / huge-batch fallback: whole tensor via jnp

    if f_main < f:
        # Ragged tail (< 128 features, or the fallback path): negligible bytes.
        p_tail = pred[:, f_main:].astype(jnp.float32)
        t_tail = tgt[:, f_main:].astype(jnp.float32)
        d_tail = jnp.sum(t_tail - p_tail, axis=0)
        sq_total = sq_total + jnp.sum(d_tail * d_tail)
        t2_total = t2_total + jnp.sum(t_tail * t_tail)

    # Normalize with the TRUE element counts (deferred 1/B, 1/B^2 scaling).
    loss = sq_total / (float(b) * float(b) * float(f))
    energy = t2_total / (float(b) * float(f)) + epsilon
    return loss / energy


def _dc_loss_ref(output, target, epsilon=1e-5):
    diff = (jnp.mean(target.astype(jnp.float32), axis=0)
            - jnp.mean(output.astype(jnp.float32), axis=0))
    loss = jnp.mean(diff ** 2)
    energy = jnp.mean(target.astype(jnp.float32) ** 2) + epsilon
    return loss / energy


if __name__ == "__main__":
    key = jax.random.PRNGKey(0)
    k1, k2 = jax.random.split(key)
    # small NCHW shapes consistent with the module's usage
    output = jax.random.normal(k1, (2, 4, 16, 16), dtype=jnp.float32)
    target = jax.random.normal(k2, (2, 4, 16, 16), dtype=jnp.float32)

    loss = dc_loss(output, target)
    jax.block_until_ready(loss)

    ref = _dc_loss_ref(output, target)
    assert jnp.allclose(loss, ref, rtol=1e-5, atol=1e-6), (loss, ref)
    print("KERNEL_OK")
</pallas_src>

<mosaic_0001>
module attributes {stable_mosaic.version = 11 : i64} {
  func.func @_dc_loss_kernel(%arg0: i32, %arg1: i32, %arg2: memref<2x8x128xf32, #tpu.memory_space<vmem>>, %arg3: memref<2x8x128xf32, #tpu.memory_space<vmem>>, %arg4: memref<1x8x128xf32, #tpu.memory_space<vmem>>, %arg5: memref<1x8x128xf32, #tpu.memory_space<vmem>>) attributes {dimension_semantics = [#tpu.dimension_semantics<parallel>, #tpu.dimension_semantics<arbitrary>], iteration_bounds = array<i64: 1, 1>, scalar_prefetch = 0 : i64, scratch_operands = 0 : i64, tpu.core_type = #tpu.core_type<tc>, window_params = [{transform_indices = @transform_0, window_bounds = array<i64: 2, 8, 128>}, {transform_indices = @transform_1, window_bounds = array<i64: 2, 8, 128>}, {transform_indices = @transform_2, window_bounds = array<i64: 1, 8, 128>}, {transform_indices = @transform_3, window_bounds = array<i64: 1, 8, 128>}]} {
    %c0_i32 = arith.constant 0 : i32
    %0 = arith.cmpi eq, %arg1, %c0_i32 : i32
    %1 = arith.extui %0 : i1 to i32
    %c0_i32_0 = arith.constant 0 : i32
    %2 = arith.cmpi ne, %1, %c0_i32_0 : i32
    scf.if %2 {
      %cst_19 = arith.constant 0.000000e+00 : f32
      %18 = vector.broadcast %cst_19 : f32 to vector<1x8x128xf32>
      %c0_20 = arith.constant 0 : index
      %c0_21 = arith.constant 0 : index
      %c0_22 = arith.constant 0 : index
      %19 = vector.load %arg4[%c0_20, %c0_21, %c0_22] : memref<1x8x128xf32, #tpu.memory_space<vmem>>, vector<1x8x128xf32>
      tpu.vector_store %arg4[%c0_20, %c0_21, %c0_22], %18 {strides = array<i32>} : memref<1x8x128xf32, #tpu.memory_space<vmem>>, vector<1x8x128xf32>,
      %cst_23 = arith.constant 0.000000e+00 : f32
      %20 = vector.broadcast %cst_23 : f32 to vector<1x8x128xf32>
      %c0_24 = arith.constant 0 : index
      %c0_25 = arith.constant 0 : index
      %c0_26 = arith.constant 0 : index
      %21 = vector.load %arg5[%c0_24, %c0_25, %c0_26] : memref<1x8x128xf32, #tpu.memory_space<vmem>>, vector<1x8x128xf32>
      tpu.vector_store %arg5[%c0_24, %c0_25, %c0_26], %20 {strides = array<i32>} : memref<1x8x128xf32, #tpu.memory_space<vmem>>, vector<1x8x128xf32>,
    } else {
    }
    %c0 = arith.constant 0 : index
    %c0_1 = arith.constant 0 : index
    %c0_2 = arith.constant 0 : index
    %3 = vector.load %arg2[%c0, %c0_1, %c0_2] : memref<2x8x128xf32, #tpu.memory_space<vmem>>, vector<2x8x128xf32>
    %c0_3 = arith.constant 0 : index
    %c0_4 = arith.constant 0 : index
    %c0_5 = arith.constant 0 : index
    %4 = vector.load %arg3[%c0_3, %c0_4, %c0_5] : memref<2x8x128xf32, #tpu.memory_space<vmem>>, vector<2x8x128xf32>
    %5 = arith.subf %4, %3 : vector<2x8x128xf32>
    %cst = arith.constant dense<0.000000e+00> : vector<8x128xf32>
    %6 = vector.multi_reduction <add>, %5, %cst [0] : vector<2x8x128xf32> to vector<8x128xf32>
    %7 = vector.shape_cast %6 : vector<8x128xf32> to vector<1x8x128xf32>
    %c0_6 = arith.constant 0 : index
    %c0_7 = arith.constant 0 : index
    %c0_8 = arith.constant 0 : index
    %8 = vector.load %arg4[%c0_6, %c0_7, %c0_8] : memref<1x8x128xf32, #tpu.memory_space<vmem>>, vector<1x8x128xf32>
    %9 = arith.mulf %7, %7 : vector<1x8x128xf32>
    %10 = arith.addf %8, %9 : vector<1x8x128xf32>
    %c0_9 = arith.constant 0 : index
    %c0_10 = arith.constant 0 : index
    %c0_11 = arith.constant 0 : index
    %11 = vector.load %arg4[%c0_9, %c0_10, %c0_11] : memref<1x8x128xf32, #tpu.memory_space<vmem>>, vector<1x8x128xf32>
    tpu.vector_store %arg4[%c0_9, %c0_10, %c0_11], %10 {strides = array<i32>} : memref<1x8x128xf32, #tpu.memory_space<vmem>>, vector<1x8x128xf32>,
    %c0_12 = arith.constant 0 : index
    %c0_13 = arith.constant 0 : index
    %c0_14 = arith.constant 0 : index
    %12 = vector.load %arg5[%c0_12, %c0_13, %c0_14] : memref<1x8x128xf32, #tpu.memory_space<vmem>>, vector<1x8x128xf32>
    %13 = arith.mulf %4, %4 : vector<2x8x128xf32>
    %cst_15 = arith.constant dense<0.000000e+00> : vector<8x128xf32>
    %14 = vector.multi_reduction <add>, %13, %cst_15 [0] : vector<2x8x128xf32> to vector<8x128xf32>
    %15 = vector.shape_cast %14 : vector<8x128xf32> to vector<1x8x128xf32>
    %16 = arith.addf %12, %15 : vector<1x8x128xf32>
    %c0_16 = arith.constant 0 : index
    %c0_17 = arith.constant 0 : index
    %c0_18 = arith.constant 0 : index
    %17 = vector.load %arg5[%c0_16, %c0_17, %c0_18] : memref<1x8x128xf32, #tpu.memory_space<vmem>>, vector<1x8x128xf32>
    tpu.vector_store %arg5[%c0_16, %c0_17, %c0_18], %16 {strides = array<i32>} : memref<1x8x128xf32, #tpu.memory_space<vmem>>, vector<1x8x128xf32>,
    return
  }
  func.func @transform_0(%arg0: i32, %arg1: i32) -> (i32, i32, i32) {
    %c1_i32 = arith.constant 1 : i32
    %0 = arith.muli %arg0, %c1_i32 : i32
    %1 = arith.addi %0, %arg1 : i32
    %c0_i32 = arith.constant 0 : i32
    %c0_i32_0 = arith.constant 0 : i32
    %c0_i32_1 = arith.constant 0 : i32
    return %c0_i32, %1, %c0_i32_0 : i32, i32, i32
  }
  func.func @transform_1(%arg0: i32, %arg1: i32) -> (i32, i32, i32) {
    %c1_i32 = arith.constant 1 : i32
    %0 = arith.muli %arg0, %c1_i32 : i32
    %1 = arith.addi %0, %arg1 : i32
    %c0_i32 = arith.constant 0 : i32
    %c0_i32_0 = arith.constant 0 : i32
    %c0_i32_1 = arith.constant 0 : i32
    return %c0_i32, %1, %c0_i32_0 : i32, i32, i32
  }
  func.func @transform_2(%arg0: i32, %arg1: i32) -> (i32, i32, i32) {
    %c0_i32 = arith.constant 0 : i32
    %c0_i32_0 = arith.constant 0 : i32
    %c0_i32_1 = arith.constant 0 : i32
    return %arg0, %c0_i32, %c0_i32_0 : i32, i32, i32
  }
  func.func @transform_3(%arg0: i32, %arg1: i32) -> (i32, i32, i32) {
    %c0_i32 = arith.constant 0 : i32
    %c0_i32_0 = arith.constant 0 : i32
    %c0_i32_1 = arith.constant 0 : i32
    return %arg0, %c0_i32, %c0_i32_0 : i32, i32, i32
  }
}

</mosaic_0001>

<bundles_post_ra>
// kernel: dc_loss.1
= control target key start
LH: loop header
LB: loop body
LE: loop exit
PB: predicated region body
PF: predicated region fallthrough
CT: control target
= control target key end

     0   :  { %9 = vsyncpa [#allocation3], 0  ;;  %s281_s0 = inlined_call_operand.hbm [shape: f32[2,8,128], index: 0, kind: input, shape index: {}]   ;;  %s282_s1 = inlined_call_operand.hbm [shape: f32[2,8,128], index: 1, kind: input, shape index: {}]   ;;  %s283_s2 = inlined_call_operand.hbm [shape: f32[1,8,128], index: 2, kind: output, shape index: {0}]   ;;  %s284_s3 = inlined_call_operand.hbm [shape: f32[1,8,128], index: 3, kind: output, shape index: {1}]  }
   0x1   :  { %10 = vsyncpa [#allocation6], 0 }
   0x2   :  { %11 = vsyncpa [#allocation4], 0 }
   0x3   :  { %12 = vsyncpa [#allocation9], 0  ;;  %s207_s12 = smov [#allocation2]   ;;  %s111_s16 = scalar_lea.hbm %s281_s0, 256 }
   0x4   :  { %s21_s13 = sshll.u32 %s207_s12, 4  ;;  %p112_p0 = scmp.ne.s32.totalorder %s281_s0, %s111_s16  ;;  %s22_s13 = int_to_ptr.vmem [resolvable:$true] %s21_s13 }
   0x5   :  { %p115_p1 = scmp.lt.u32.totalorder %s111_s16, %s281_s0 }
   0x7   :  { %p117_p2 = pnand %p115_p1, %p112_p0 }
   0x9   :  { %120 = shalt.err (!%p117_p2)
}
   0xa   :  { %s121_s21 = scalar_lea.vmem %s22_s13, 256  ;;  %p126_p4 = scmp.lt.s32.totalorder %s22_s13, %s22_s13 }
   0xb   :  { %p122_p3 = scmp.ne.s32.totalorder %s22_s13, %s121_s21  ;;  %p127_p5 = scmp.lt.s32.totalorder %s121_s21, %s121_s21 }
   0xd   :  { %p128_p6 = por %p127_p5, %p126_p4 }
   0xf   :  { %p129_p7 = pnand %p128_p6, %p122_p3 }
  0x11   :  { %132 = shalt.err (!%p129_p7)
}
  0x12   :  { %s208_s22 = smov 128   ;;  %s209_s23 = smov 8  }
  0x13   :  { %27 = dma.hbm_to_vmem [thread:$0]  %s281_s0, 256, %s22_s13, [#allocation3], %s208_s22, %s208_s22, %s209_s23  }
  0x14   :  { %s210_s26 = smov [#allocation5]   ;;  %s133_s30 = scalar_lea.hbm %s282_s1, 256 }
  0x15   :  { %s36_s27 = sshll.u32 %s210_s26, 4  ;;  %p134_p8 = scmp.ne.s32.totalorder %s282_s1, %s133_s30  ;;  %s37_s27 = int_to_ptr.vmem [resolvable:$true] %s36_s27 }
  0x16   :  { %p137_p9 = scmp.lt.u32.totalorder %s133_s30, %s282_s1 }
  0x18   :  { %p139_p10 = pnand %p137_p9, %p134_p8 }
  0x1a   :  { %142 = shalt.err (!%p139_p10)
}
  0x1b   :  { %s143_s8 = scalar_lea.vmem %s37_s27, 256  ;;  %p148_p12 = scmp.lt.s32.totalorder %s37_s27, %s37_s27 }
  0x1c   :  { %p144_p11 = scmp.ne.s32.totalorder %s37_s27, %s143_s8  ;;  %p149_p13 = scmp.lt.s32.totalorder %s143_s8, %s143_s8 }
  0x1e   :  { %p150_p0 = por %p149_p13, %p148_p12 }
  0x20   :  { %p151_p1 = pnand %p150_p0, %p144_p11 }
  0x22   :  { %154 = shalt.err (!%p151_p1)
}
  0x23   :  { %42 = dma.hbm_to_vmem [thread:$0]  %s282_s1, 256, %s37_s27, [#allocation6], %s208_s22, %s208_s22, %s209_s23  }
  0x24   :  { %199 = dma.done.wait [#allocation3], 256  }
  0x25   :  { %200 = vsyncadd [#allocation3], 4294967040 }
  0x26   :  { %201 = dma.done.wait [#allocation6], 256  }
  0x27   :  { %202 = vsyncadd [#allocation6], 4294967040  ;;  %v57_v0 = vld [vmem:[#allocation2] sm:$0xff]  ;;  %v58_v1 = vld [vmem:[#allocation2 + $0x8] sm:$0xff]  ;;  %s211_s10 = smov [#allocation8]   ;;  %s212_s12 = smov [#allocation7]  }
  0x28   :  { %v59_v2 = vld [vmem:[#allocation5] sm:$0xff]  ;;  %v60_v3 = vld [vmem:[#allocation5 + $0x8] sm:$0xff]  ;;  %s90_s11 = sshll.u32 %s211_s10, 4  ;;  %s80_s13 = sshll.u32 %s212_s12, 4  ;;  %s91_s11 = int_to_ptr.vmem [resolvable:$true] %s90_s11  ;;  %s81_s13 = int_to_ptr.vmem [resolvable:$true] %s80_s13 }
  0x29   :  { %v61_v4 = vsub.f32 %v59_v2, %v57_v0  ;;  %v69_v5 = vmul.f32 %v59_v2, %v59_v2  ;;  %v62_v6 = vsub.f32 %v60_v3, %v58_v1  ;;  %v70_v7 = vmul.f32 %v60_v3, %v60_v3  ;;  %s155_s1 = scalar_lea.vmem %s91_s11, 128  ;;  %p160_p3 = scmp.lt.s32.totalorder %s91_s11, %s91_s11 }
  0x2a   :  { %p156_p2 = scmp.ne.s32.totalorder %s91_s11, %s155_s1  ;;  %p161_p4 = scmp.lt.s32.totalorder %s155_s1, %s155_s1 }
  0x2b   :  { %v63_v8 = vadd.f32 %v62_v6, %v61_v4  ;;  %v71_v9 = vadd.f32 %v70_v7, %v69_v5 }
  0x2c   :  { %p162_p5 = por %p161_p4, %p160_p3 }
  0x2d   :  { %v65_v10 = vmul.f32 %v63_v8, %v63_v8  ;;  %73 = vst [vmem:[#allocation8] sm:$0xff] %v71_v9 }
  0x2e   :  { %p163_p6 = pnand %p162_p5, %p156_p2 }
  0x30   :  { %166 = shalt.err (!%p163_p6)
}
  0x31   :  { %s167_s16 = scalar_lea.hbm %s284_s3, 128 }
  0x32   :  { %p168_p7 = scmp.ne.s32.totalorder %s284_s3, %s167_s16  ;;  %p171_p8 = scmp.lt.u32.totalorder %s167_s16, %s284_s3 }
  0x34   :  { %p173_p9 = pnand %p171_p8, %p168_p7 }
  0x36   :  { %176 = shalt.err (!%p173_p9)
}
  0x37   :  { %93 = dma.vmem_to_hbm [thread:$0]  %s91_s11, 128, %s284_s3, [#allocation9]   ;;  %67 = vst [vmem:[#allocation7] sm:$0xff] %v65_v10 }
  0x38   :  { %s177_s23 = scalar_lea.vmem %s81_s13, 128  ;;  %p182_p11 = scmp.lt.s32.totalorder %s81_s13, %s81_s13 }
  0x39   :  { %p178_p10 = scmp.ne.s32.totalorder %s81_s13, %s177_s23  ;;  %p183_p12 = scmp.lt.s32.totalorder %s177_s23, %s177_s23 }
  0x3b   :  { %p184_p13 = por %p183_p12, %p182_p11 }
  0x3d   :  { %p185_p0 = pnand %p184_p13, %p178_p10 }
  0x3f   :  { %188 = shalt.err (!%p185_p0)
}
  0x40   :  { %s189_s26 = scalar_lea.hbm %s283_s2, 128 }
  0x41   :  { %p190_p1 = scmp.ne.s32.totalorder %s283_s2, %s189_s26  ;;  %p193_p2 = scmp.lt.u32.totalorder %s189_s26, %s283_s2 }
  0x43   :  { %p195_p3 = pnand %p193_p2, %p190_p1 }
  0x45   :  { %198 = shalt.err (!%p195_p3)
}
  0x46   :  { %83 = dma.vmem_to_hbm [thread:$0]  %s81_s13, 128, %s283_s2, [#allocation4]  }
  0x47   :  { %203 = dma.done.wait [#allocation4], 128  }
  0x48   :  { %204 = vsyncadd [#allocation4], 4294967168 }
  0x49   :  { %205 = dma.done.wait [#allocation9], 128  }
  0x4a   :  { %206 = vsyncadd [#allocation9], 4294967168 }
  0x4b   :  { %100 = vsyncpa [#allocation3], 1 }
  0x4c   :  { %101 = vsyncpa [#allocation6], 1 }
  0x4d   :  { %102 = vsyncpa [#allocation4], 1 }
  0x4e   :  { %103 = vsyncpa [#allocation9], 1 }

</bundles_post_ra>
